<compile_context>
chip_gen: v7x
topology: tpu7x:2x2x1
jax: 0.10.0
libtpu: 0.0.40
codegen_flags: <defaults>
</compile_context>

<pallas_src>
import functools

import jax
import jax.numpy as jnp
from jax import lax
from jax.experimental import pallas as pl
from jax.experimental.pallas import tpu as pltpu


def cross_modal_attn_kernel(x_ref, y_ref, mb_ref,
                            wq_ref, bq_ref, wk_ref, bk_ref, wv_ref, bv_ref,
                            wf_ref, bf_ref,
                            o_ref, *, num_heads, head_dim):
    cd = x_ref.dtype                       # MXU operand dtype (f32 or bf16)

    x = x_ref[0]                           # (T, D)
    y = y_ref[0]                           # (S, D)
    mb = mb_ref[0]                         # (T, 1) f32 additive mask bias

    # Full-width projections for all heads at once (K = N = D -> full MXU fill).
    # The attention scale is already folded into wq / bq by the wrapper.
    q_all = (jnp.dot(x, wq_ref[...], preferred_element_type=jnp.float32)
             + bq_ref[...]).astype(cd)     # (T, D)
    k_all = (jnp.dot(y, wk_ref[...], preferred_element_type=jnp.float32)
             + bk_ref[...]).astype(cd)     # (S, D)
    v_all = (jnp.dot(y, wv_ref[...], preferred_element_type=jnp.float32)
             + bv_ref[...]).astype(cd)     # (S, D)

    # Per-head attention: short, fully unrolled static loop (num_heads is small).
    # TODO(synk): for large S*T, tile the S (key) axis with a fori_loop here; the
    # softmax is per-s-column local so S-tiling is exact (no online softmax needed).
    heads = []
    for h in range(num_heads):
        lo = h * head_dim
        hi = lo + head_dim
        q_h = q_all[:, lo:hi]              # (T, dh)
        k_h = k_all[:, lo:hi]              # (S, dh)
        v_h = v_all[:, lo:hi]              # (S, dh)

        # Flipped orientation: scores[t, s] = q_h[t] . k_h[s]
        # (== PyTorch scores[s, t] of einsum('bhsd,bhnd->bhsn', k, q)).
        scores = lax.dot_general(q_h, k_h, (((1,), (1,)), ((), ())),
                                 preferred_element_type=jnp.float32)   # (T, S)
        scores = scores + mb               # mask suppresses query rows t, bcast over S

        # Softmax over the query axis T (axis 0 here == PyTorch dim=-1); f32 math.
        scores = scores - jnp.max(scores, axis=0, keepdims=True)
        p = jnp.exp(scores)
        p = p * pl.reciprocal(jnp.sum(p, axis=0, keepdims=True), approx=True)

        # out_h[t, d] = sum_s p[t, s] * v_h[s, d]  — native (T,S)@(S,dh), no transpose.
        out_h = lax.dot_general(p.astype(cd), v_h, (((1,), (0,)), ((), ())),
                                preferred_element_type=jnp.float32)    # (T, dh)
        heads.append(out_h.astype(cd))

    # 'b h n d -> b n (h d)' head recombination, then ONE full-width ff matmul.
    attn = jnp.concatenate(heads, axis=-1)                             # (T, D)
    out = (jnp.dot(attn, wf_ref[...], preferred_element_type=jnp.float32)
           + bf_ref[...])                                              # (T, D) f32
    o_ref[0] = out.astype(o_ref.dtype)


def _vmem_limit_bytes():
    """Generation-aware VMEM limit: ~75% of physical per-core VMEM
    (v5e/v6e: 128 MiB -> ~96 MiB; v7x: 64 MiB -> ~48 MiB)."""
    try:
        cap = pltpu.get_tpu_info().vmem_capacity_bytes
        return int(cap) * 3 // 4
    except Exception:
        return None   # fall back to the compiler default scoped limit


def cross_modal_attention(seq_x, seq_y, mask, params, *, num_heads=4,
                          scale_exp=0.2, mxu_dtype=jnp.bfloat16):
    """seq_x: (B, T, D), seq_y: (B, S, D), mask: (B, T) float {0,1}.

    params = (wq, bq, wkv, bkv, wf, bf) with weights stored (in, out) so that
    y = x @ W + b  (i.e. W = torch_weight.T), biases shaped (1, out).
    """
    B, T, D = seq_x.shape
    S = seq_y.shape[1]
    assert D % num_heads == 0
    H = num_heads
    dh = D // H
    scale = float(D) ** (-scale_exp)
    wq, bq, wkv, bkv, wf, bf = params

    f32 = jnp.float32

    # --- wrapper-side parameter prep (done once, outside the kernel) ---------
    # Fold the attention scale into the Q projection; split Wkv into K / V so the
    # kernel never slices the 2D-wide projection output.
    wq_s = wq.astype(f32) * scale                    # (D, D)
    bq_s = bq.astype(f32) * scale                    # (1, D)
    wk = wkv[:, :D]                                  # (D, D)
    wv = wkv[:, D:]                                  # (D, D)
    bk = bkv[:, :D].astype(f32)                      # (1, D)
    bv = bkv[:, D:].astype(f32)                      # (1, D)
    bf_f = bf.astype(f32)                            # (1, D)

    # MXU operand dtype (bf16 is the fast path on v5e/v6e/v7x); accumulation stays f32.
    x = seq_x.astype(mxu_dtype)
    y = seq_y.astype(mxu_dtype)
    wq_c = wq_s.astype(mxu_dtype)
    wk_c = wk.astype(mxu_dtype)
    wv_c = wv.astype(mxu_dtype)
    wf_c = wf.astype(mxu_dtype)

    # Precomputed additive mask bias in the flipped (T, S) scores orientation.
    mask_bias = ((1.0 - mask.astype(f32)) * (-10000.0)).reshape(B, T, 1)

    kernel = functools.partial(cross_modal_attn_kernel,
                               num_heads=H, head_dim=dh)

    # TODO(synk): if B == 1 on v7x (2 TensorCores), add a parallel S-tile grid axis
    # so both cores have work; with B >= 2 the batch axis already splits cleanly.
    return pl.pallas_call(
        kernel,
        out_shape=jax.ShapeDtypeStruct((B, T, D), seq_x.dtype),
        grid_spec=pltpu.PrefetchScalarGridSpec(
            num_scalar_prefetch=0,
            grid=(B,),
            in_specs=[
                pl.BlockSpec((1, T, D), lambda b: (b, 0, 0)),   # seq_x
                pl.BlockSpec((1, S, D), lambda b: (b, 0, 0)),   # seq_y
                pl.BlockSpec((1, T, 1), lambda b: (b, 0, 0)),   # mask bias (T, 1)
                # grid-resident weights / biases: fetched from HBM exactly once
                pl.BlockSpec((D, D), lambda b: (0, 0)),         # Wq (scale folded)
                pl.BlockSpec((1, D), lambda b: (0, 0)),         # bq (scale folded)
                pl.BlockSpec((D, D), lambda b: (0, 0)),         # Wk
                pl.BlockSpec((1, D), lambda b: (0, 0)),         # bk
                pl.BlockSpec((D, D), lambda b: (0, 0)),         # Wv
                pl.BlockSpec((1, D), lambda b: (0, 0)),         # bv
                pl.BlockSpec((D, D), lambda b: (0, 0)),         # Wf
                pl.BlockSpec((1, D), lambda b: (0, 0)),         # bf
            ],
            out_specs=pl.BlockSpec((1, T, D), lambda b: (b, 0, 0)),
        ),
        compiler_params=pltpu.CompilerParams(
            dimension_semantics=("parallel",),
            vmem_limit_bytes=_vmem_limit_bytes()),
    )(x, y, mask_bias, wq_c, bq_s, wk_c, bk, wv_c, bv, wf_c, bf_f)


def reference_forward(seq_x, seq_y, mask, params, *, num_heads, scale_exp=0.2):
    """Plain-JAX re-statement of the PyTorch forward (eval mode) for validation."""
    wq, bq, wkv, bkv, wf, bf = params
    B, T, D = seq_x.shape
    dh = D // num_heads
    scale = float(D) ** (-scale_exp)

    q = seq_x @ wq + bq
    kv = seq_y @ wkv + bkv
    k, v = kv[..., :D], kv[..., D:]

    def split_heads(a):   # 'b s (h d) -> b h s d'
        b, s, _ = a.shape
        return a.reshape(b, s, num_heads, dh).transpose(0, 2, 1, 3)

    qh, kh, vh = split_heads(q), split_heads(k), split_heads(v)
    scores = jnp.einsum('bhsd,bhnd->bhsn', kh, qh) * scale
    scores = scores + (1.0 - mask)[:, None, None, :] * (-10000.0)
    w = jax.nn.softmax(scores, axis=-1)
    out = jnp.einsum('bhsn,bhsd->bhnd', w, vh)                     # (B, h, T, dh)
    out = out.transpose(0, 2, 1, 3).reshape(B, T, D)               # 'b h n d -> b n (h d)'
    return out @ wf + bf


if __name__ == "__main__":
    B, T, S, D, H = 2, 8, 12, 32, 4   # batch, traj len, text len, hidden, heads

    key = jax.random.PRNGKey(0)
    kx, ky, kmask, k1, k2, k3, k4, k5, k6 = jax.random.split(key, 9)

    seq_x = jax.random.normal(kx, (B, T, D), dtype=jnp.float32)
    seq_y = jax.random.normal(ky, (B, S, D), dtype=jnp.float32)
    mask = (jax.random.uniform(kmask, (B, T)) > 0.3).astype(jnp.float32)

    # Deterministic synthetic parameters (Linear(D,D), Linear(D,2D), Linear(D,D)).
    # Weights stored as (in, out); biases as (1, out).
    wq  = jax.random.normal(k1, (D, D),     dtype=jnp.float32) * 0.05
    bq  = jax.random.normal(k2, (1, D),     dtype=jnp.float32) * 0.05
    wkv = jax.random.normal(k3, (D, 2 * D), dtype=jnp.float32) * 0.05
    bkv = jax.random.normal(k4, (1, 2 * D), dtype=jnp.float32) * 0.05
    wf  = jax.random.normal(k5, (D, D),     dtype=jnp.float32) * 0.05
    bf  = jax.random.normal(k6, (1, D),     dtype=jnp.float32) * 0.05
    params = (wq, bq, wkv, bkv, wf, bf)

    ref = reference_forward(seq_x, seq_y, mask, params, num_heads=H)

    # f32 MXU operands: tight check against the plain-JAX reference
    # (approx EUP reciprocal in the softmax is the only approximation).
    out_f32 = jax.block_until_ready(
        cross_modal_attention(seq_x, seq_y, mask, params,
                              num_heads=H, mxu_dtype=jnp.float32))
    assert out_f32.shape == (B, T, D)
    assert jnp.allclose(out_f32, ref, atol=5e-3, rtol=5e-3), "f32 path mismatch"

    # bf16 MXU operands / f32 accumulation: recommended perf path on all generations.
    out_bf16 = jax.block_until_ready(
        cross_modal_attention(seq_x, seq_y, mask, params,
                              num_heads=H, mxu_dtype=jnp.bfloat16))
    assert out_bf16.shape == (B, T, D)
    assert jnp.allclose(out_bf16, ref, atol=3e-2, rtol=3e-2), "bf16 path mismatch"

    # TODO(synk): ff_layer Dropout(0.1) is identity in eval mode; training-mode RNG
    # dropout (and the return_attentions=True branch) are not implemented.
    print("KERNEL_OK")
</pallas_src>

<mosaic_0001>
module attributes {stable_mosaic.version = 11 : i64} {
  func.func @cross_modal_attn_kernel(%arg0: i32, %arg1: memref<1x8x32xf32, #tpu.memory_space<vmem>>, %arg2: memref<1x12x32xf32, #tpu.memory_space<vmem>>, %arg3: memref<1x8x1xf32, #tpu.memory_space<vmem>>, %arg4: memref<32x32xf32, #tpu.memory_space<vmem>>, %arg5: memref<1x32xf32, #tpu.memory_space<vmem>>, %arg6: memref<32x32xf32, #tpu.memory_space<vmem>>, %arg7: memref<1x32xf32, #tpu.memory_space<vmem>>, %arg8: memref<32x32xf32, #tpu.memory_space<vmem>>, %arg9: memref<1x32xf32, #tpu.memory_space<vmem>>, %arg10: memref<32x32xf32, #tpu.memory_space<vmem>>, %arg11: memref<1x32xf32, #tpu.memory_space<vmem>>, %arg12: memref<1x8x32xf32, #tpu.memory_space<vmem>>) attributes {dimension_semantics = [#tpu.dimension_semantics<parallel>], iteration_bounds = array<i64: 2>, scalar_prefetch = 0 : i64, scratch_operands = 0 : i64, tpu.core_type = #tpu.core_type<tc>, window_params = [{transform_indices = @transform_0, window_bounds = array<i64: 1, 8, 32>}, {transform_indices = @transform_1, window_bounds = array<i64: 1, 12, 32>}, {transform_indices = @transform_2, window_bounds = array<i64: 1, 8, 1>}, {pipeline_mode = #tpu.pipeline_mode<synchronous>, transform_indices = @transform_3, window_bounds = array<i64: 32, 32>}, {pipeline_mode = #tpu.pipeline_mode<synchronous>, transform_indices = @transform_4, window_bounds = array<i64: 1, 32>}, {pipeline_mode = #tpu.pipeline_mode<synchronous>, transform_indices = @transform_5, window_bounds = array<i64: 32, 32>}, {pipeline_mode = #tpu.pipeline_mode<synchronous>, transform_indices = @transform_6, window_bounds = array<i64: 1, 32>}, {pipeline_mode = #tpu.pipeline_mode<synchronous>, transform_indices = @transform_7, window_bounds = array<i64: 32, 32>}, {pipeline_mode = #tpu.pipeline_mode<synchronous>, transform_indices = @transform_8, window_bounds = array<i64: 1, 32>}, {pipeline_mode = #tpu.pipeline_mode<synchronous>, transform_indices = @transform_9, window_bounds = array<i64: 32, 32>}, {pipeline_mode = #tpu.pipeline_mode<synchronous>, transform_indices = @transform_10, window_bounds = array<i64: 1, 32>}, {transform_indices = @transform_11, window_bounds = array<i64: 1, 8, 32>}]} {
    %c0 = arith.constant 0 : index
    %c0_0 = arith.constant 0 : index
    %c0_1 = arith.constant 0 : index
    %0 = vector.load %arg1[%c0, %c0_0, %c0_1] : memref<1x8x32xf32, #tpu.memory_space<vmem>>, vector<1x8x32xf32>
    %1 = vector.shape_cast %0 : vector<1x8x32xf32> to vector<8x32xf32>
    %c0_2 = arith.constant 0 : index
    %c0_3 = arith.constant 0 : index
    %c0_4 = arith.constant 0 : index
    %2 = vector.load %arg2[%c0_2, %c0_3, %c0_4] : memref<1x12x32xf32, #tpu.memory_space<vmem>>, vector<1x12x32xf32>
    %3 = vector.shape_cast %2 : vector<1x12x32xf32> to vector<12x32xf32>
    %c0_5 = arith.constant 0 : index
    %c0_6 = arith.constant 0 : index
    %c0_7 = arith.constant 0 : index
    %4 = vector.load %arg3[%c0_5, %c0_6, %c0_7] : memref<1x8x1xf32, #tpu.memory_space<vmem>>, vector<1x8x1xf32>
    %5 = vector.shape_cast %4 : vector<1x8x1xf32> to vector<8x1xf32>
    %c0_8 = arith.constant 0 : index
    %c0_9 = arith.constant 0 : index
    %6 = vector.load %arg4[%c0_8, %c0_9] : memref<32x32xf32, #tpu.memory_space<vmem>>, vector<32x32xf32>
    %cst = arith.constant dense<0.000000e+00> : vector<8x32xf32>
    %7 = tpu.matmul %1, %6, %cst {dimension_numbers = #tpu.dot_dimension_numbers<[1], [0], [0], [1], [0, 0, 1, 1], [], []>} : vector<8x32xf32>, vector<32x32xf32>, vector<8x32xf32> -> vector<8x32xf32>
    %c0_10 = arith.constant 0 : index
    %c0_11 = arith.constant 0 : index
    %8 = vector.load %arg5[%c0_10, %c0_11] : memref<1x32xf32, #tpu.memory_space<vmem>>, vector<1x32xf32>
    %9 = vector.broadcast %8 : vector<1x32xf32> to vector<8x32xf32>
    %10 = arith.addf %7, %9 : vector<8x32xf32>
    %c0_12 = arith.constant 0 : index
    %c0_13 = arith.constant 0 : index
    %11 = vector.load %arg6[%c0_12, %c0_13] : memref<32x32xf32, #tpu.memory_space<vmem>>, vector<32x32xf32>
    %cst_14 = arith.constant dense<0.000000e+00> : vector<12x32xf32>
    %12 = tpu.matmul %3, %11, %cst_14 {dimension_numbers = #tpu.dot_dimension_numbers<[1], [0], [0], [1], [0, 0, 1, 1], [], []>} : vector<12x32xf32>, vector<32x32xf32>, vector<12x32xf32> -> vector<12x32xf32>
    %c0_15 = arith.constant 0 : index
    %c0_16 = arith.constant 0 : index
    %13 = vector.load %arg7[%c0_15, %c0_16] : memref<1x32xf32, #tpu.memory_space<vmem>>, vector<1x32xf32>
    %14 = vector.broadcast %13 : vector<1x32xf32> to vector<12x32xf32>
    %15 = arith.addf %12, %14 : vector<12x32xf32>
    %c0_17 = arith.constant 0 : index
    %c0_18 = arith.constant 0 : index
    %16 = vector.load %arg8[%c0_17, %c0_18] : memref<32x32xf32, #tpu.memory_space<vmem>>, vector<32x32xf32>
    %cst_19 = arith.constant dense<0.000000e+00> : vector<12x32xf32>
    %17 = tpu.matmul %3, %16, %cst_19 {dimension_numbers = #tpu.dot_dimension_numbers<[1], [0], [0], [1], [0, 0, 1, 1], [], []>} : vector<12x32xf32>, vector<32x32xf32>, vector<12x32xf32> -> vector<12x32xf32>
    %c0_20 = arith.constant 0 : index
    %c0_21 = arith.constant 0 : index
    %18 = vector.load %arg9[%c0_20, %c0_21] : memref<1x32xf32, #tpu.memory_space<vmem>>, vector<1x32xf32>
    %19 = vector.broadcast %18 : vector<1x32xf32> to vector<12x32xf32>
    %20 = arith.addf %17, %19 : vector<12x32xf32>
    %21 = vector.extract_strided_slice %10 {offsets = [0, 0], sizes = [8, 8], strides = [1, 1]} : vector<8x32xf32> to vector<8x8xf32>
    %22 = vector.extract_strided_slice %15 {offsets = [0, 0], sizes = [12, 8], strides = [1, 1]} : vector<12x32xf32> to vector<12x8xf32>
    %23 = vector.extract_strided_slice %20 {offsets = [0, 0], sizes = [12, 8], strides = [1, 1]} : vector<12x32xf32> to vector<12x8xf32>
    %cst_22 = arith.constant dense<0.000000e+00> : vector<8x12xf32>
    %24 = tpu.matmul %21, %22, %cst_22 {dimension_numbers = #tpu.dot_dimension_numbers<[1], [1], [0], [0], [0, 0, 1, 0], [], []>} : vector<8x8xf32>, vector<12x8xf32>, vector<8x12xf32> -> vector<8x12xf32>
    %25 = vector.broadcast %5 : vector<8x1xf32> to vector<8x12xf32>
    %26 = arith.addf %24, %25 : vector<8x12xf32>
    %cst_23 = arith.constant dense<0xFF800000> : vector<12xf32>
    %27 = vector.multi_reduction <maximumf>, %26, %cst_23 [0] : vector<8x12xf32> to vector<12xf32>
    %28 = vector.shape_cast %27 : vector<12xf32> to vector<1x12xf32>
    %29 = vector.broadcast %28 : vector<1x12xf32> to vector<8x12xf32>
    %30 = arith.subf %26, %29 : vector<8x12xf32>
    %31 = math.exp %30 : vector<8x12xf32>
    %cst_24 = arith.constant dense<0.000000e+00> : vector<12xf32>
    %32 = vector.multi_reduction <add>, %31, %cst_24 [0] : vector<8x12xf32> to vector<12xf32>
    %33 = vector.shape_cast %32 : vector<12xf32> to vector<1x12xf32>
    %34 = tpu.reciprocal %33 {approx = true} : vector<1x12xf32> -> vector<1x12xf32>
    %35 = vector.broadcast %34 : vector<1x12xf32> to vector<8x12xf32>
    %36 = arith.mulf %31, %35 : vector<8x12xf32>
    %cst_25 = arith.constant dense<0.000000e+00> : vector<8x8xf32>
    %37 = tpu.matmul %36, %23, %cst_25 {dimension_numbers = #tpu.dot_dimension_numbers<[1], [0], [0], [1], [0, 0, 1, 1], [], []>} : vector<8x12xf32>, vector<12x8xf32>, vector<8x8xf32> -> vector<8x8xf32>
    %38 = vector.extract_strided_slice %10 {offsets = [0, 8], sizes = [8, 8], strides = [1, 1]} : vector<8x32xf32> to vector<8x8xf32>
    %39 = vector.extract_strided_slice %15 {offsets = [0, 8], sizes = [12, 8], strides = [1, 1]} : vector<12x32xf32> to vector<12x8xf32>
    %40 = vector.extract_strided_slice %20 {offsets = [0, 8], sizes = [12, 8], strides = [1, 1]} : vector<12x32xf32> to vector<12x8xf32>
    %cst_26 = arith.constant dense<0.000000e+00> : vector<8x12xf32>
    %41 = tpu.matmul %38, %39, %cst_26 {dimension_numbers = #tpu.dot_dimension_numbers<[1], [1], [0], [0], [0, 0, 1, 0], [], []>} : vector<8x8xf32>, vector<12x8xf32>, vector<8x12xf32> -> vector<8x12xf32>
    %42 = vector.broadcast %5 : vector<8x1xf32> to vector<8x12xf32>
    %43 = arith.addf %41, %42 : vector<8x12xf32>
    %cst_27 = arith.constant dense<0xFF800000> : vector<12xf32>
    %44 = vector.multi_reduction <maximumf>, %43, %cst_27 [0] : vector<8x12xf32> to vector<12xf32>
    %45 = vector.shape_cast %44 : vector<12xf32> to vector<1x12xf32>
    %46 = vector.broadcast %45 : vector<1x12xf32> to vector<8x12xf32>
    %47 = arith.subf %43, %46 : vector<8x12xf32>
    %48 = math.exp %47 : vector<8x12xf32>
    %cst_28 = arith.constant dense<0.000000e+00> : vector<12xf32>
    %49 = vector.multi_reduction <add>, %48, %cst_28 [0] : vector<8x12xf32> to vector<12xf32>
    %50 = vector.shape_cast %49 : vector<12xf32> to vector<1x12xf32>
    %51 = tpu.reciprocal %50 {approx = true} : vector<1x12xf32> -> vector<1x12xf32>
    %52 = vector.broadcast %51 : vector<1x12xf32> to vector<8x12xf32>
    %53 = arith.mulf %48, %52 : vector<8x12xf32>
    %cst_29 = arith.constant dense<0.000000e+00> : vector<8x8xf32>
    %54 = tpu.matmul %53, %40, %cst_29 {dimension_numbers = #tpu.dot_dimension_numbers<[1], [0], [0], [1], [0, 0, 1, 1], [], []>} : vector<8x12xf32>, vector<12x8xf32>, vector<8x8xf32> -> vector<8x8xf32>
    %55 = vector.extract_strided_slice %10 {offsets = [0, 16], sizes = [8, 8], strides = [1, 1]} : vector<8x32xf32> to vector<8x8xf32>
    %56 = vector.extract_strided_slice %15 {offsets = [0, 16], sizes = [12, 8], strides = [1, 1]} : vector<12x32xf32> to vector<12x8xf32>
    %57 = vector.extract_strided_slice %20 {offsets = [0, 16], sizes = [12, 8], strides = [1, 1]} : vector<12x32xf32> to vector<12x8xf32>
    %cst_30 = arith.constant dense<0.000000e+00> : vector<8x12xf32>
    %58 = tpu.matmul %55, %56, %cst_30 {dimension_numbers = #tpu.dot_dimension_numbers<[1], [1], [0], [0], [0, 0, 1, 0], [], []>} : vector<8x8xf32>, vector<12x8xf32>, vector<8x12xf32> -> vector<8x12xf32>
    %59 = vector.broadcast %5 : vector<8x1xf32> to vector<8x12xf32>
    %60 = arith.addf %58, %59 : vector<8x12xf32>
    %cst_31 = arith.constant dense<0xFF800000> : vector<12xf32>
    %61 = vector.multi_reduction <maximumf>, %60, %cst_31 [0] : vector<8x12xf32> to vector<12xf32>
    %62 = vector.shape_cast %61 : vector<12xf32> to vector<1x12xf32>
    %63 = vector.broadcast %62 : vector<1x12xf32> to vector<8x12xf32>
    %64 = arith.subf %60, %63 : vector<8x12xf32>
    %65 = math.exp %64 : vector<8x12xf32>
    %cst_32 = arith.constant dense<0.000000e+00> : vector<12xf32>
    %66 = vector.multi_reduction <add>, %65, %cst_32 [0] : vector<8x12xf32> to vector<12xf32>
    %67 = vector.shape_cast %66 : vector<12xf32> to vector<1x12xf32>
    %68 = tpu.reciprocal %67 {approx = true} : vector<1x12xf32> -> vector<1x12xf32>
    %69 = vector.broadcast %68 : vector<1x12xf32> to vector<8x12xf32>
    %70 = arith.mulf %65, %69 : vector<8x12xf32>
    %cst_33 = arith.constant dense<0.000000e+00> : vector<8x8xf32>
    %71 = tpu.matmul %70, %57, %cst_33 {dimension_numbers = #tpu.dot_dimension_numbers<[1], [0], [0], [1], [0, 0, 1, 1], [], []>} : vector<8x12xf32>, vector<12x8xf32>, vector<8x8xf32> -> vector<8x8xf32>
    %72 = vector.extract_strided_slice %10 {offsets = [0, 24], sizes = [8, 8], strides = [1, 1]} : vector<8x32xf32> to vector<8x8xf32>
    %73 = vector.extract_strided_slice %15 {offsets = [0, 24], sizes = [12, 8], strides = [1, 1]} : vector<12x32xf32> to vector<12x8xf32>
    %74 = vector.extract_strided_slice %20 {offsets = [0, 24], sizes = [12, 8], strides = [1, 1]} : vector<12x32xf32> to vector<12x8xf32>
    %cst_34 = arith.constant dense<0.000000e+00> : vector<8x12xf32>
    %75 = tpu.matmul %72, %73, %cst_34 {dimension_numbers = #tpu.dot_dimension_numbers<[1], [1], [0], [0], [0, 0, 1, 0], [], []>} : vector<8x8xf32>, vector<12x8xf32>, vector<8x12xf32> -> vector<8x12xf32>
    %76 = vector.broadcast %5 : vector<8x1xf32> to vector<8x12xf32>
    %77 = arith.addf %75, %76 : vector<8x12xf32>
    %cst_35 = arith.constant dense<0xFF800000> : vector<12xf32>
    %78 = vector.multi_reduction <maximumf>, %77, %cst_35 [0] : vector<8x12xf32> to vector<12xf32>
    %79 = vector.shape_cast %78 : vector<12xf32> to vector<1x12xf32>
    %80 = vector.broadcast %79 : vector<1x12xf32> to vector<8x12xf32>
    %81 = arith.subf %77, %80 : vector<8x12xf32>
    %82 = math.exp %81 : vector<8x12xf32>
    %cst_36 = arith.constant dense<0.000000e+00> : vector<12xf32>
    %83 = vector.multi_reduction <add>, %82, %cst_36 [0] : vector<8x12xf32> to vector<12xf32>
    %84 = vector.shape_cast %83 : vector<12xf32> to vector<1x12xf32>
    %85 = tpu.reciprocal %84 {approx = true} : vector<1x12xf32> -> vector<1x12xf32>
    %86 = vector.broadcast %85 : vector<1x12xf32> to vector<8x12xf32>
    %87 = arith.mulf %82, %86 : vector<8x12xf32>
    %cst_37 = arith.constant dense<0.000000e+00> : vector<8x8xf32>
    %88 = tpu.matmul %87, %74, %cst_37 {dimension_numbers = #tpu.dot_dimension_numbers<[1], [0], [0], [1], [0, 0, 1, 1], [], []>} : vector<8x12xf32>, vector<12x8xf32>, vector<8x8xf32> -> vector<8x8xf32>
    %89 = tpu.concatenate %37, %54, %71, %88 in 1 : vector<8x8xf32>, vector<8x8xf32>, vector<8x8xf32>, vector<8x8xf32> -> vector<8x32xf32>
    %c0_38 = arith.constant 0 : index
    %c0_39 = arith.constant 0 : index
    %90 = vector.load %arg10[%c0_38, %c0_39] : memref<32x32xf32, #tpu.memory_space<vmem>>, vector<32x32xf32>
    %cst_40 = arith.constant dense<0.000000e+00> : vector<8x32xf32>
    %91 = tpu.matmul %89, %90, %cst_40 {dimension_numbers = #tpu.dot_dimension_numbers<[1], [0], [0], [1], [0, 0, 1, 1], [], []>} : vector<8x32xf32>, vector<32x32xf32>, vector<8x32xf32> -> vector<8x32xf32>
    %c0_41 = arith.constant 0 : index
    %c0_42 = arith.constant 0 : index
    %92 = vector.load %arg11[%c0_41, %c0_42] : memref<1x32xf32, #tpu.memory_space<vmem>>, vector<1x32xf32>
    %93 = vector.broadcast %92 : vector<1x32xf32> to vector<8x32xf32>
    %94 = arith.addf %91, %93 : vector<8x32xf32>
    %c0_43 = arith.constant 0 : index
    %c0_44 = arith.constant 0 : index
    %c0_45 = arith.constant 0 : index
    %95 = vector.load %arg12[%c0_43, %c0_44, %c0_45] : memref<1x8x32xf32, #tpu.memory_space<vmem>>, vector<1x8x32xf32>
    %96 = vector.shape_cast %95 : vector<1x8x32xf32> to vector<8x32xf32>
    %97 = vector.shape_cast %94 : vector<8x32xf32> to vector<1x8x32xf32>
    tpu.vector_store %arg12[%c0_43, %c0_44, %c0_45], %97 {strides = array<i32>} : memref<1x8x32xf32, #tpu.memory_space<vmem>>, vector<1x8x32xf32>,
    return
  }
  func.func @transform_0(%arg0: i32) -> (i32, i32, i32) {
    %c0_i32 = arith.constant 0 : i32
    %c0_i32_0 = arith.constant 0 : i32
    %c0_i32_1 = arith.constant 0 : i32
    return %arg0, %c0_i32, %c0_i32_0 : i32, i32, i32
  }
  func.func @transform_1(%arg0: i32) -> (i32, i32, i32) {
    %c0_i32 = arith.constant 0 : i32
    %c0_i32_0 = arith.constant 0 : i32
    %c0_i32_1 = arith.constant 0 : i32
    return %arg0, %c0_i32, %c0_i32_0 : i32, i32, i32
  }
  func.func @transform_2(%arg0: i32) -> (i32, i32, i32) {
    %c0_i32 = arith.constant 0 : i32
    %c0_i32_0 = arith.constant 0 : i32
    %c0_i32_1 = arith.constant 0 : i32
    return %arg0, %c0_i32, %c0_i32_0 : i32, i32, i32
  }
  func.func @transform_3(%arg0: i32) -> (i32, i32) {
    %c0_i32 = arith.constant 0 : i32
    %c0_i32_0 = arith.constant 0 : i32
    %c0_i32_1 = arith.constant 0 : i32
    return %c0_i32, %c0_i32_0 : i32, i32
  }
  func.func @transform_4(%arg0: i32) -> (i32, i32) {
    %c0_i32 = arith.constant 0 : i32
    %c0_i32_0 = arith.constant 0 : i32
    %c0_i32_1 = arith.constant 0 : i32
    return %c0_i32, %c0_i32_0 : i32, i32
  }
  func.func @transform_5(%arg0: i32) -> (i32, i32) {
    %c0_i32 = arith.constant 0 : i32
    %c0_i32_0 = arith.constant 0 : i32
    %c0_i32_1 = arith.constant 0 : i32
    return %c0_i32, %c0_i32_0 : i32, i32
  }
  func.func @transform_6(%arg0: i32) -> (i32, i32) {
    %c0_i32 = arith.constant 0 : i32
    %c0_i32_0 = arith.constant 0 : i32
    %c0_i32_1 = arith.constant 0 : i32
    return %c0_i32, %c0_i32_0 : i32, i32
  }
  func.func @transform_7(%arg0: i32) -> (i32, i32) {
    %c0_i32 = arith.constant 0 : i32
    %c0_i32_0 = arith.constant 0 : i32
    %c0_i32_1 = arith.constant 0 : i32
    return %c0_i32, %c0_i32_0 : i32, i32
  }
  func.func @transform_8(%arg0: i32) -> (i32, i32) {
    %c0_i32 = arith.constant 0 : i32
    %c0_i32_0 = arith.constant 0 : i32
    %c0_i32_1 = arith.constant 0 : i32
    return %c0_i32, %c0_i32_0 : i32, i32
  }
  func.func @transform_9(%arg0: i32) -> (i32, i32) {
    %c0_i32 = arith.constant 0 : i32
    %c0_i32_0 = arith.constant 0 : i32
    %c0_i32_1 = arith.constant 0 : i32
    return %c0_i32, %c0_i32_0 : i32, i32
  }
  func.func @transform_10(%arg0: i32) -> (i32, i32) {
    %c0_i32 = arith.constant 0 : i32
    %c0_i32_0 = arith.constant 0 : i32
    %c0_i32_1 = arith.constant 0 : i32
    return %c0_i32, %c0_i32_0 : i32, i32
  }
  func.func @transform_11(%arg0: i32) -> (i32, i32, i32) {
    %c0_i32 = arith.constant 0 : i32
    %c0_i32_0 = arith.constant 0 : i32
    %c0_i32_1 = arith.constant 0 : i32
    return %arg0, %c0_i32, %c0_i32_0 : i32, i32, i32
  }
}

</mosaic_0001>

<bundles_post_ra>
// kernel: tpu_custom_call.1
= control target key start
LH: loop header
LB: loop body
LE: loop exit
PB: predicated region body
PF: predicated region fallthrough
CT: control target
= control target key end

     0   :  { %s2778_s0 = inlined_call_operand.hbm [shape: f32[2,8,32], index: 0, kind: input, shape index: {}]   ;;  %s2779_s1 = inlined_call_operand.vmem [shape: f32[2,12,32], index: 1, kind: input, shape index: {}]   ;;  %s2780_s2 = inlined_call_operand.vmem [shape: f32[2,8,1], index: 2, kind: input, shape index: {}]   ;;  %s2781_s3 = inlined_call_operand.vmem [shape: f32[32,32], index: 3, kind: input, shape index: {}]   ;;  %s2782_s4 = inlined_call_operand.hbm [shape: f32[1,32], index: 4, kind: input, shape index: {}]   ;;  %s2783_s5 = inlined_call_operand.vmem [shape: f32[32,32], index: 5, kind: input, shape index: {}]   ;;  %s2784_s6 = inlined_call_operand.hbm [shape: f32[1,32], index: 6, kind: input, shape index: {}]   ;;  %s2785_s7 = inlined_call_operand.vmem [shape: f32[32,32], index: 7, kind: input, shape index: {}]   ;;  %s2786_s8 = inlined_call_operand.vmem [shape: f32[1,32], index: 8, kind: input, shape index: {}]   ;;  %s2787_s9 = inlined_call_operand.hbm [shape: f32[32,32], index: 9, kind: input, shape index: {}]   ;;  %s2788_s10 = inlined_call_operand.vmem [shape: f32[1,32], index: 10, kind: input, shape index: {}]   ;;  %s2789_s11 = inlined_call_operand.hbm [shape: f32[2,8,32], index: 11, kind: output, shape index: {}]  }
   0x1   :  { %2797 = sst [smem:[#allocation17_spill]] %s2778_s0 }
   0x2   :  { %2798 = sst [smem:[#allocation18_spill]] %s2782_s4 }
   0x3   :  { %2799 = sst [smem:[#allocation19_spill]] %s2789_s11 }
   0x4   :  { %16 = vsyncpa [#allocation3], 0 }
   0x5   :  { %18 = vsyncpa [#allocation3 + $0x1], 0 }
   0x6   :  { %19 = vsyncpa [#allocation6], 0 }
   0x7   :  { %20 = vsyncpa [#allocation9], 0 }
   0x8   :  { %21 = vsyncpa [#allocation4], 0 }
   0x9   :  { %23 = vsyncpa [#allocation4 + $0x1], 0  ;;  %s2374_s17 = smov 0   ;;  %s2376_s18 = smov 0  }
   0xa   :  { %s2378_s19 = smov 0   ;;  %s2380_s20 = smov 0  }
   0xb LB: > { %2800 = sst [smem:[#allocation15_spill]] %s2282_s17  ;;  %s2395_s21 = sadd.s32 4294967295, %s2294_s20   ;;  %s2294_s20 = sphi %s2380_s20, %s2831_s20   ;;  %s2290_s19 = sphi %s2378_s19, %s2830_s19   ;;  %s2286_s18 = sphi %s2376_s18, %s2829_s18   ;;  %s2282_s17 = sphi %s2374_s17, %s2828_s17  }
   0xc   : > { %s1711_s22 = sadd.s32 4294967294, %s2294_s20   ;;  %p49_p0 = scmp.ne.s32.totalorder %s2286_s18, %s2282_s17 }
   0xd   : > { %p2791_p1 = scmp.eq.s32.totalorder %s2395_s21, 0  ;;  %p299_p3 = scmp.eq.s32.totalorder %s1711_s22, 1 }
   0xe   : > { %p1712_p5 = scmp.ge.s32.totalorder %s2294_s20, 1  ;;  %p306_p7 = scmp.lt.s32.totalorder %s2294_s20, 3 }
   0xf   : > { %p2404_p4 = por %p2791_p1, %p49_p0  ;;  %p2409_p6 = por %p299_p3, %p49_p0 }
  0x10   : > { %p2414_p8 = pnand %p1712_p5, %p306_p7  ;;  %s2296_s26 = smov [#allocation5]  }
  0x11   : > { %s2801_s23 = scalar_select %p2404_p4, 1, 0 }
  0x12   : > { %s2802_s24 = scalar_select %p2409_p6, 1, 0 }
  0x13   : > { %s2804_s25 = scalar_select %p2414_p8, 1, 0 }
  0x14   : > { %2803 = sst [smem:[#allocation16_spill]] %s2802_s24  ;;  %s322_s27 = sshll.u32 %s2296_s26, 4  ;;  %s323_s27 = int_to_ptr.vmem [resolvable:$true] %s322_s27 }
  0x15   : > { %p1985_p10 = pneg %p2414_p8  ;;  %s2297_s28 = smov [#allocation7]  }
  0x16   : > { %s336_s29 = sshll.u32 %s2297_s28, 4  ;;  %s2298_s12 = smov [#allocation8]   ;;  %s2427_s29 = int_to_ptr.vmem [resolvable:$true] %s336_s29 }
  0x17   : > { %p2423_p11 = pnand %p1985_p10, %p2791_p1  ;;  %s352_s13 = sshll.u32 %s2298_s12, 4  ;;  %s2429_s13 = int_to_ptr.vmem [resolvable:$true] %s352_s13 }
  0x18   : > { %s2806_s4 = sld [smem:[#allocation18_spill]] }
  0x19   : > { %p2439_p13 = pneg %p2423_p11 }
  0x1e   : > { %s2106_s16 = scalar_lea.hbm %s2806_s4, 16 }
  0x1f   : > { %p2107_p12 = scmp.ne.s32.totalorder %s2806_s4, %s2106_s16  ;;  %p2113_p5 = scmp.lt.u32.totalorder %s2106_s16, %s2806_s4 }
  0x21   : > { %p2109_p0 = pnand %p2439_p13, %p2107_p12 }
  0x23   : > { %p2110_p3 = pneg %p2109_p0 }
  0x25   : > { %p2115_p7 = pnand %p2113_p5, %p2110_p3 }
  0x27   : > { %2118 = shalt.err (!%p2115_p7)
}
  0x28   : > { %s2119_s14 = scalar_lea.vmem %s323_s27, 16  ;;  %s2126_s15 = scalar_lea.vmem %s323_s27, 32 }
  0x29   : > { %p2120_p10 = scmp.ne.s32.totalorder %s323_s27, %s2119_s14  ;;  %p2127_p2 = scmp.lt.s32.totalorder %s323_s27, %s323_s27 }
  0x2a   : > { %p2128_p6 = scmp.lt.s32.totalorder %s2126_s15, %s2119_s14 }
  0x2b   : > { %p2122_p9 = pnand %p2120_p10, %p2439_p13 }
  0x2c   : > { %p2129_p4 = por %p2128_p6, %p2127_p2 }
  0x2d   : > { %p2123_p1 = pneg %p2122_p9 }
  0x2f   : > { %p2130_p8 = pnand %p2129_p4, %p2123_p1 }
  0x31   : > { %2133 = shalt.err (!%p2130_p8)
}
  0x32   : > { %1988 = dma.hbm_to_vmem [thread:$0]  (!%p2423_p11), %s2806_s4, 16, %s323_s27, [#allocation6]  }
  0x33   : > { %s2134_s12 = scalar_lea.hbm %s2784_s6, 16 }
  0x34   : > { %p2135_p9 = scmp.ne.s32.totalorder %s2784_s6, %s2134_s12  ;;  %p2141_p1 = scmp.lt.u32.totalorder %s2134_s12, %s2784_s6 }
  0x36   : > { %p2137_p12 = pnand %p2135_p9, %p2439_p13 }
  0x38   : > { %p2138_p2 = pneg %p2137_p12 }
  0x3a   : > { %p2143_p4 = pnand %p2141_p1, %p2138_p2 }
  0x3c   : > { %2146 = shalt.err (!%p2143_p4)
}
  0x3d   : > { %s2147_s27 = scalar_lea.vmem %s2427_s29, 16  ;;  %s2154_s11 = scalar_lea.vmem %s2427_s29, 32 }
  0x3e   : > { %p2148_p6 = scmp.ne.s32.totalorder %s2427_s29, %s2147_s27  ;;  %p2155_p3 = scmp.lt.s32.totalorder %s2427_s29, %s2427_s29 }
  0x3f   : > { %p2156_p5 = scmp.lt.s32.totalorder %s2154_s11, %s2147_s27 }
  0x40   : > { %p2150_p8 = pnand %p2148_p6, %p2439_p13 }
  0x41   : > { %p2157_p7 = por %p2156_p5, %p2155_p3 }
  0x42   : > { %p2151_p0 = pneg %p2150_p8 }
  0x44   : > { %p2158_p10 = pnand %p2157_p7, %p2151_p0 }
  0x46   : > { %2161 = shalt.err (!%p2158_p10)
}
  0x47   : > { %1991 = dma.hbm_to_vmem [thread:$0]  (!%p2423_p11), %s2784_s6, 16, %s2427_s29, [#allocation6]  }
  0x48   : > { %s2162_s16 = scalar_lea.hbm %s2787_s9, 512 }
  0x49   : > { %p2163_p9 = scmp.ne.s32.totalorder %s2787_s9, %s2162_s16  ;;  %p2169_p1 = scmp.lt.u32.totalorder %s2162_s16, %s2787_s9 }
  0x4b   : > { %p2165_p12 = pnand %p2163_p9, %p2439_p13 }
  0x4d   : > { %p2166_p2 = pneg %p2165_p12 }
  0x4f   : > { %p2171_p4 = pnand %p2169_p1, %p2166_p2 }
  0x51   : > { %2174 = shalt.err (!%p2171_p4)
}
  0x52   : > { %s2175_s29 = scalar_lea.vmem %s2429_s13, 512  ;;  %p2183_p3 = scmp.lt.s32.totalorder %s2429_s13, %s2429_s13 }
  0x53   : > { %p2176_p6 = scmp.ne.s32.totalorder %s2429_s13, %s2175_s29  ;;  %p2184_p5 = scmp.lt.s32.totalorder %s2175_s29, %s2175_s29 }
  0x55   : > { %p2178_p8 = pnand %p2176_p6, %p2439_p13  ;;  %p2185_p7 = por %p2184_p5, %p2183_p3 }
  0x57   : > { %p2179_p0 = pneg %p2178_p8 }
  0x59   : > { %p2186_p10 = pnand %p2185_p7, %p2179_p0 }
  0x5b   : > { %2189 = shalt.err (!%p2186_p10)
}
  0x5c   : > { %s2299_s11 = smov 128   ;;  %s2300_s28 = smov 8  }
  0x5d   : > { %1994 = dma.hbm_to_vmem [thread:$0]  (!%p2423_p11), %s2787_s9, 512, %s2429_s13, [#allocation9], %s2299_s11, %s2299_s11, %s2300_s28  }
  0x5e   : > { %s2503_s26 = sadd.s32 1, %s2294_s20   ;;  %s36_s16 = sadd.s32 1, %s2290_s19 }
  0x5f   : > { %s33_s24 = ssub.s32 %s2294_s20, %s2503_s26  ;;  %p43_p9 = scmp.ne.s32.totalorder %s2290_s19, %s2286_s18 }
  0x60   : > { %p34_p13 = scmp.eq.s32.totalorder %s33_s24, 0  ;;  %p44_p12 = scmp.eq.s32.totalorder %s2294_s20, 0 }
  0x61   : > { %p2006_p2 = scmp.lt.s32.totalorder %s2294_s20, 2  ;;  %p2808_p4 = scmp.eq.s32.totalorder %s2395_s21, 1 }
  0x62   : > { %s2513_s12 = scalar_select %p34_p13, %s2290_s19, %s36_s16  }
  0x63   : > { %p45_p1 = por %p44_p12, %p43_p9  ;;  %p2517_p6 = por %p2808_p4, %p43_p9 }
  0x64   : > { %s369_s30 = sand.u32 1, %s2290_s19   ;;  %s1718_s15 = sshll.u32 %s2294_s20, 7 }
  0x65   : > { %s1717_s13 = sshll.u32 %s369_s30, 3  ;;  %s2810_s0 = sld [smem:[#allocation17_spill]] }
  0x66   : > { %s373_s28 = scalar_lea.vmem [#allocation2], %s1717_s13  ;;  %p2528_p11 = pnand %p2006_p2, %p45_p1 }
  0x67   : > { %s380_s17 = sshll.u32 %s373_s28, 4  ;;  %s370_s24 = scalar_lea.sflag [#allocation3], %s369_s30  ;;  %s2532_s17 = int_to_ptr.vmem [resolvable:$true] %s380_s17 }
  0x68   : > { %p2192_p0 = pneg %p2528_p11 }
  0x6b   : > { %s2526_s11 = scalar_lea.hbm %s2810_s0, %s1718_s15  ;;  %s2195_s27 = scalar_lea.hbm %s2810_s0, 256 }
  0x6c   : > { %s2190_s16 = scalar_lea.hbm %s2526_s11, 128  ;;  %p2196_p7 = scmp.lt.u32.totalorder %s2526_s11, %s2810_s0 }
  0x6d   : > { %p2191_p8 = scmp.ne.s32.totalorder %s2526_s11, %s2190_s16  ;;  %p2197_p10 = scmp.lt.u32.totalorder %s2195_s27, %s2190_s16 }
  0x6e   : > { %p2199_p9 = scmp.lt.u32.totalorder %s2190_s16, %s2526_s11 }
  0x6f   : > { %p2193_p3 = pnand %p2192_p0, %p2191_p8  ;;  %p2198_p13 = por %p2197_p10, %p2196_p7 }
  0x71   : > { %p2194_p5 = pneg %p2193_p3  ;;  %p2200_p12 = por %p2199_p9, %p2198_p13 }
  0x73   : > { %p2201_p2 = pnand %p2200_p12, %p2194_p5 }
  0x75   : > { %2204 = shalt.err (!%p2201_p2)
}
  0x76   : > { %s2205_s30 = scalar_lea.vmem %s2532_s17, 128  ;;  %s2301_s15 = smov [#allocation2]  }
  0x77   : > { %p2206_p1 = scmp.ne.s32.totalorder %s2532_s17, %s2205_s30  ;;  %s2210_s13 = sshll.u32 %s2301_s15, 4  ;;  %s2211_s13 = int_to_ptr.vmem [resolvable:$false] %s2210_s13 }
  0x78   : > { %s2212_s29 = scalar_lea.vmem %s2211_s13, 256  ;;  %p2213_p3 = scmp.lt.s32.totalorder %s2532_s17, %s2211_s13 }
  0x79   : > { %p2208_p4 = pnand %p2206_p1, %p2192_p0  ;;  %p2214_p7 = scmp.lt.s32.totalorder %s2212_s29, %s2205_s30 }
  0x7b   : > { %p2209_p8 = pneg %p2208_p4  ;;  %p2215_p10 = por %p2214_p7, %p2213_p3 }
  0x7d   : > { %p2216_p13 = pnand %p2215_p10, %p2209_p8 }
  0x7f   : > { %2219 = shalt.err (!%p2216_p13)
}
  0x80   : > { %1998 = dma.hbm_to_vmem [thread:$0]  (!%p2528_p11), %s2526_s11, 128, %s2532_s17, %s370_s24  }
  0x81   : > { %p2812_p5 = scmp.ne.s32.totalorder %s2804_s25, 0 }
  0x82   : > { %s2562_s16 = sand.u32 (!%p2812_p5), 1, %s2286_s18   ;;  %p2813_p0 = scmp.ne.s32.totalorder (!%p2812_p5), %s2801_s23, 0 }
  0x83   : > { %404 = sbr.rel (%p2812_p5) target bundleno = 2035 (0x7f3), region = 64  ;;  %s2796_s27 = sshll.u32 (!%p2812_p5), %s2562_s16, 3 }
  0x84   : > { %s407_s28 = scalar_lea.sflag (!%p2812_p5), [#allocation3], %s2562_s16  ;;  %s2568_s30 = scalar_lea.vmem (!%p2812_p5), [#allocation2], %s2796_s27 }
  0x8a   : > { %2265 = dma.done.wait (%p2813_p0), %s407_s28, 128  }
  0x8b   : > { %2267 = vsyncadd (%p2813_p0), %s407_s28, 4294967168  ;;  %p2814_p11 = scmp.eq.s32.totalorder %s2395_s21, 0 }
  0x8d   : > { %2269 = dma.done.wait (%p2814_p11), [#allocation6], 32   ;;  %p2815_p9 = pmov %p2814_p11 }
  0x8f   : > { %2271 = vsyncadd (%p2815_p9), [#allocation6], 4294967264  ;;  %p2816_p12 = pmov %p2815_p9 }
  0x90   : > { %p2817_p2 = pmov %p2815_p9 }
  0x91   : > { %2273 = dma.done.wait (%p2816_p12), [#allocation9], 512  }
  0x92   : > { %2275 = vsyncadd (%p2817_p2), [#allocation9], 4294966784  ;;  %p470_p1 = scmp.lt.s32.totalorder %s2395_s21, 1  ;;  %v2302_v0 = vmov 0.0|0.0   ;;  %vm2303_vm0 = vmmov 0   ;;  %v2304_v1 = vmov 0.0  }
  0x93   : > { %1909 = vmatprep.subr.bf16.mxu0 %v2302_v0  ;;  %1817 = vmatprep.mubr.msk.f32.mxu0 %vm2303_vm0, %v2304_v1  ;;  %v2305_v2 = vmov 0   ;;  %v483_v3 = vld [vmem:[%s2781_s3] sm:$0xff]  ;;  %v484_v4 = vld [vmem:[%s2781_s3 + $0x8] sm:$0xff]  ;;  %vm494_vm1 = vcmask 261120   ;;  %v485_v8 = vld [vmem:[%s2781_s3 + $0x10] sm:$0xff]  ;;  %vm751_vm2 = vcmask 64512  }
  0x94   : > { %s471_s23 = scalar_select %p470_p1, %s2395_s21, 1  ;;  %2059 = vset.pattern.permute.xlu0 %v2305_v2  ;;  %v568_v5 = vld [vmem:[%s2783_s5] sm:$0xff]  ;;  %v1910_v6 = vpack.c.bf16 %v484_v4, %v483_v3  ;;  %v569_v7 = vld [vmem:[%s2783_s5 + $0x8] sm:$0xff]  ;;  %v486_v9 = vld [vmem:[%s2781_s3 + $0x18] sm:$0xff]  ;;  %vm854_vm4 = vcmask 1043456   ;;  %vm2309_vm5 = vmmov 1  }
  0x95   : > { %v1915_v10 = vpack.c.bf16 %v569_v7, %v568_v5  ;;  %v570_v11 = vld [vmem:[%s2783_s5 + $0x10] sm:$0xff]  ;;  %v571_v12 = vld [vmem:[%s2783_s5 + $0x18] sm:$0xff]  ;;  %v1913_v14 = vpack.c.bf16 %v486_v9, %v485_v8  ;;  %v660_v16 = vld [vmem:[%s2785_s7] sm:$0xff]  ;;  %s2307_s4 = smov 112   ;;  %s2308_s28 = smov 104   ;;  %vm831_vm7 = vcmask 97280  }
  0x96   : > { %s1762_s25 = sshll.u32 %s471_s23, 4  ;;  %s1727_s24 = sshll.u32 %s471_s23, 3  ;;  %1911 = vmatpush3.bf16.msra.mxu0 %v1910_v6  ;;  %v1919_v15 = vpack.c.bf16 %v571_v12, %v570_v11  ;;  %v661_v17 = vld [vmem:[%s2785_s7 + $0x8] sm:$0xff]  ;;  %v662_v19 = vld [vmem:[%s2785_s7 + $0x10] sm:$0xff]  ;;  %v663_v20 = vld [vmem:[%s2785_s7 + $0x18] sm:$0xff]  ;;  %vm1485_vm8 = vcmask 130048  }
  0x97   : > { %s2590_s22 = scalar_lea.vmem %s2779_s1, %s1762_s25  ;;  %s478_s11 = scalar_lea.vmem %s2780_s2, %s1727_s24  ;;  %1916 = vmatprep.subr.bf16.mxu1 %v1915_v10  ;;  %1912 = vmatprep.subr.bf16.mxu0 %v2302_v0  ;;  %v1923_v18 = vpack.c.bf16 %v661_v17, %v660_v16  ;;  %v479_v22 = vld [vmem:[%s2568_s30] sm:$0xff]  ;;  %v1927_v23 = vpack.c.bf16 %v663_v20, %v662_v19  ;;  %v1728_v25 = vld [vmem:[#allocation5] ss:$0 sm:$0xff]  ;;  %v1730_v26 = vld [vmem:[#allocation7] ss:$0 sm:$0xff]  ;;  %vm1487_vm9 = vcmask 195584  }
  0x98   : > { %v480_v13 = vld [vmem:[%s2590_s22] sm:$0xff]  ;;  %1918 = vmatpush3.bf16.msra.mxu1 %v1915_v10  ;;  %v481_v24 = vld [vmem:[%s2590_s22 + $0x8] sm:$0xf]  ;;  %s2306_s30 = smov 120   ;;  %vm2648_vm3 = vmpackc.low %vm751_vm2, %vm751_vm2  ;;  %s2311_s25 = smov 16  }
  0x99   : > { %1828 = vmatprep.mubr.msk.f32.mxu1 %vm494_vm1, %v480_v13  ;;  %v482_v21 = vld [vmem:[%s478_s11] sm:$0xff]  ;;  %1920 = vmatprep.subr.bf16.mxu1 %v1919_v15  ;;  %vm2661_vm6 = vmpackc.low %vm854_vm4, %vm2309_vm5  ;;  %s2310_s11 = smov 8   ;;  %s2312_s23 = smov 24  }
  0x9a   : > { %748 = vperm.xlu0 %2059, %v482_v21   ;;  %1914 = vmatpush3.bf16.msra.mxu0 %v1913_v14  ;;  %v1733_v37 = vld [vmem:[%s2786_s8] ss:$0 sm:$0xff]  ;;  %s1759_s24 = sshll.u32 %s2395_s21, 7  ;;  %s2822_s13 = sshll.u32 %s2562_s16, 3 }
  0x9b   : > { %1924 = vmatprep.subr.bf16.mxu0 %v1923_v18  ;;  %s469_s29 = scalar_lea.vmem [#allocation10], %s2822_s13  ;;  %s2823_s27 = sld [smem:[#allocation19_spill]] }
  0x9c   : > { %1922 = vmatpush3.bf16.msra.mxu1 %v1919_v15  ;;  %s1588_s0 = sshll.u32 %s469_s29, 4  ;;  %s2735_s0 = int_to_ptr.vmem [resolvable:$true] %s1588_s0 }
  0x9d   : > { %1818 = vmatmul.mubr.msk.f32.vlgmr.msra.gmra.mrb[0].mxu0 %vm494_vm1, %v479_v22  ;;  %1931 = vmatprep.subr.bf16.mxu1 %v2302_v0  ;;  %s2220_s21 = scalar_lea.vmem %s2735_s0, 128 }
  0x9e   : > { %1926 = vmatpush3.bf16.msra.mxu0 %v1923_v18  ;;  %1839 = vmatprep.mubr.msk.f32.mxu0 %vm494_vm1, %v480_v13  ;;  %p2221_p4 = scmp.ne.s32.totalorder %s2735_s0, %s2220_s21 }
  0x9f   : > { %1829 = vmatmul.mubr.msk.f32.vlgmr.msra.gmra.mrb[0].mxu1 %vm494_vm1, %v481_v24  ;;  %1928 = vmatprep.subr.bf16.mxu0 %v1927_v23 }
  0xa0   : > { %1846 = vmatprep.mubr.msk.f32.mxu1 %vm2303_vm0, %v2304_v1  ;;  %p2222_p8 = pnand %p2221_p4, %p2517_p6 }
  0xa2   : > { %1930 = vmatpush3.bf16.msra.mxu0 %v1927_v23  ;;  %p2223_p3 = pneg %p2222_p8 }
  0xa3   : > { %1943 = vmatprep.subr.bf16.mxu0 %v2302_v0 }
  0xa5   : > { %1840 = vmatmul.mubr.msk.f32.vlgmr.msra.gmra.mrb[2].mxu0 %vm494_vm1, %v481_v24 }
  0xa6   : > { %1867 = vmatprep.mubr.msk.f32.mxu0 %vm2303_vm0, %v2304_v1 }
 0x119   : > { %v2671_v50 = vpop.permute.xlu0 %748 }
 0x170   : > { %v564_v27 = vpop.f32.mrb[0].mxu0 }
 0x171   : > { %v565_v28 = vadd.f32 %v1728_v25, %v564_v27  ;;  %v1819_v29 = vpop.f32.mrb[1].mxu0 }
 0x172   : > { %v1830_v30 = vpop.f32.mrb[0].mxu1 }
 0x173   : > { %v657_v31 = vadd.f32 %v1830_v30, %v1730_v26  ;;  %v651_v32 = vpop.f32.mrb[1].mxu1  ;;  %928 = vrot.lane.b32.xlu1 %v565_v28, %s2306_s30 }
 0x174   : > { %v652_v33 = vadd.f32 %v1730_v26, %v651_v32 }
 0x176   : > { %v1932_v35 = vpack.c.bf16 %v657_v31, %v652_v33  ;;  %v2060_v36 = vpack.i.bf16 %v657_v31, %v652_v33 }
 0x178   : > { %2061 = vrot.lane.b32.xlu0 %v2060_v36, %s2306_s30  ;;  %1934 = vmatpush3.bf16.xpose.msk.msra.mxu1 %vm2648_vm3, %v1932_v35  ;;  %v1841_v38 = vpop.f32.mrb[2].mxu0 }
 0x179   : > { %v743_v39 = vadd.f32 %v1841_v38, %v1733_v37  ;;  %v737_v40 = vpop.f32.mrb[3].mxu0  ;;  %1935 = vmatprep.subr.bf16.mxu1 %v2302_v0 }
 0x17a   : > { %v738_v41 = vadd.f32 %v1733_v37, %v737_v40 }
 0x17c   : > { %2071 = vrot.lane.b32.xlu0 %v2060_v36, %s2307_s4  ;;  %v2065_v42 = vpack.i.bf16 %v743_v39, %v738_v41  ;;  %v1936_v47 = vpack.c.bf16 %v743_v39, %v738_v41 }
 0x17e   : > { %2066 = vrot.lane.b32.xlu1 %v2065_v42, %s2306_s30 }
 0x17f   : > { %1847 = vmatmul.mubr.msk.f32.vlgmr.msra.gmra.mrb[2].mxu1 %vm751_vm2, %v565_v28 }
 0x180   : > { %2076 = vrot.lane.b32.xlu0 %v2065_v42, %s2307_s4  ;;  %1853 = vmatprep.mubr.msk.f32.mxu1 %vm2303_vm0, %v2304_v1 }
 0x181   : > { %1938 = vmatpush3.bf16.msk.msra.mxu1 %vm2661_vm6, %v1936_v47 }
 0x182   : > { %1110 = vrot.lane.b32.xlu1 %v565_v28, %s2307_s4  ;;  %1939 = vmatprep.subr.bf16.mxu1 %v2302_v0  ;;  %s2733_s4 = scalar_lea.hbm %s2823_s27, %s1759_s24 }
 0x184   : > { %1291 = vrot.lane.b32.xlu0 %v565_v28, %s2308_s28 }
 0x186   : > { %2081 = vrot.lane.b32.xlu1 %v2060_v36, %s2308_s28 }
 0x18a   : > { %2086 = vrot.lane.b32.xlu1 %v2065_v42, %s2308_s28  ;;  %s1575_s28 = scalar_lea.sflag [#allocation4], %s2562_s16 }
 0x1e5   : > { %v929_v43 = vpop.permute.xlu1 %928 }
 0x1ea   : > { %v2062_v9 = vpop.permute.xlu0 %2061 }
 0x1eb   : > { %v2064_v11 = vunpack.i.h.bf16 %v2062_v9  ;;  %v2063_v12 = vunpack.i.l.bf16 %v2062_v9 }
 0x1ed   : > { %v1940_v15 = vpack.c.bf16 %v2064_v11, %v2063_v12 }
 0x1ee   : > { %v2072_v10 = vpop.permute.xlu0 %2071 }
 0x1f0   : > { %v2067_v44 = vpop.permute.xlu1 %2066 }
 0x1f1   : > { %v2069_v45 = vunpack.i.h.bf16 %v2067_v44  ;;  %v2068_v46 = vunpack.i.l.bf16 %v2067_v44  ;;  %v2074_v44 = vunpack.i.h.bf16 %v2072_v10 }
 0x1f2   : > { %v2077_v16 = vpop.permute.xlu0 %2076 }
 0x1f3   : > { %v1944_v48 = vpack.c.bf16 %v2069_v45, %v2068_v46  ;;  %v2079_v17 = vunpack.i.h.bf16 %v2077_v16  ;;  %v2078_v18 = vunpack.i.l.bf16 %v2077_v16  ;;  %v2073_v45 = vunpack.i.l.bf16 %v2072_v10 }
 0x1f5   : > { %1946 = vmatpush3.bf16.msk.msra.mxu0 %vm2661_vm6, %v1944_v48  ;;  %v1952_v19 = vpack.c.bf16 %v2079_v17, %v2078_v18 }
 0x1f6   : > { %1947 = vmatprep.subr.bf16.mxu0 %v2302_v0 }
 0x252   : > { %v827_v51 = vpop.f32.mrb[2].mxu1 }
 0x253   : > { %v828_v52 = vadd.f32 %v827_v51, %v2671_v50  ;;  %v1848_v53 = vpop.f32.mrb[3].mxu1  ;;  %v1948_v51 = vpack.c.bf16 %v2074_v44, %v2073_v45  ;;  %v1489_v45 = vld [vmem:[#allocation8] sm:$0xff] }
 0x255   : > { %v832_v54 = vsel %vm831_vm7, %v828_v52, -inf }
 0x256   : > { %v833_v55 = vrot.slane %v832_v54, 4 }
 0x258   : > { %v834_v56 = vmax.f32 %v832_v54, %v833_v55 }
 0x25a   : > { %v835_v57 = vrot.slane %v834_v56, 2 }
 0x25c   : > { %v836_v58 = vmax.f32 %v834_v56, %v835_v57 }
 0x25e   : > { %v837_v59 = vrot.slane %v836_v58, 1 }
 0x260   : > { %v838_v60 = vmax.f32 %v836_v58, %v837_v59 }
 0x262   : > { %v839_v61 = vsub.f32 %v828_v52, %v838_v60 }
 0x264   : > { %v840_v62 = vmul.f32 1.442695, %v839_v61 }
 0x266   : > { %2090 = vpow2.f32 %v840_v62 }
 0x270   : > { %v2091_v63 = vpop.eup %2090 }
 0x271   : > { %v842_v2 = vsel %vm831_vm7, %v2091_v63, 0.0 }
 0x272   : > { %v843_v3 = vrot.slane %v842_v2, 4 }
 0x274   : > { %v844_v4 = vadd.f32 %v843_v3, %v842_v2 }
 0x276   : > { %v845_v5 = vrot.slane %v844_v4, 2 }
 0x278   : > { %v846_v6 = vadd.f32 %v845_v5, %v844_v4 }
 0x27a   : > { %v847_v7 = vrot.slane %v846_v6, 1 }
 0x27c   : > { %v848_v8 = vadd.f32 %v847_v7, %v846_v6 }
 0x27e   : > { %2092 = vrcp.f32 %v848_v8 }
 0x288   : > { %v2093_v13 = vpop.eup %2092 }
 0x289   : > { %v850_v14 = vmul.f32 %v2093_v13, %v2091_v63 }
 0x28b   : > { %1854 = vmatmul.mubr.msk.f32.vlgmr.msra.gmra.mrb[4].mxu1 %vm831_vm7, %v850_v14 }
 0x28c   : > { %1942 = vmatpush3.bf16.xpose.msk.msra.mxu1 %vm2648_vm3, %v1940_v15  ;;  %1860 = vmatprep.mubr.msk.f32.mxu1 %vm2303_vm0, %v2304_v1 }
 0x28d   : > { %1951 = vmatprep.subr.bf16.mxu1 %v2302_v0 }
 0x293   : > { %1861 = vmatmul.mubr.msk.f32.vlgmr.msra.gmra.mrb[6].mxu1 %vm751_vm2, %v929_v43  ;;  %v1111_v43 = vpop.permute.xlu1 %1110 }
 0x294   : > { %1954 = vmatpush3.bf16.msk.msra.mxu1 %vm2661_vm6, %v1952_v19  ;;  %1881 = vmatprep.mubr.msk.f32.mxu1 %vm2303_vm0, %v2304_v1 }
 0x295   : > { %1955 = vmatprep.subr.bf16.mxu1 %v2302_v0 }
 0x297   : > { %v2082_v46 = vpop.permute.xlu1 %2081 }
 0x298   : > { %v2084_v15 = vunpack.i.h.bf16 %v2082_v46  ;;  %v2083_v16 = vunpack.i.l.bf16 %v2082_v46  ;;  %v1490_v46 = vld [vmem:[#allocation8 + $0x8] sm:$0xff] }
 0x29a   : > { %v1956_v19 = vpack.c.bf16 %v2084_v15, %v2083_v16 }
 0x29b   : > { %v2087_v52 = vpop.permute.xlu1 %2086 }
 0x29c   : > { %v2089_v53 = vunpack.i.h.bf16 %v2087_v52  ;;  %v2088_v54 = vunpack.i.l.bf16 %v2087_v52 }
 0x29e   : > { %v1960_v55 = vpack.c.bf16 %v2089_v53, %v2088_v54 }
 0x35e   : > { %v2688_v20 = vpop.f32.mrb[4].mxu1 }
 0x35f   : > { %v1855_v21 = vpop.f32.mrb[5].mxu1 }
 0x360   : > { %v1292_v21 = vpop.permute.xlu0 %1291 }
 0x366   : > { %v1006_v22 = vpop.f32.mrb[6].mxu1 }
 0x367   : > { %v1007_v23 = vadd.f32 %v1006_v22, %v2671_v50  ;;  %v1862_v24 = vpop.f32.mrb[7].mxu1 }
 0x369   : > { %v1010_v25 = vsel %vm831_vm7, %v1007_v23, -inf }
 0x36a   : > { %v1011_v26 = vrot.slane %v1010_v25, 4 }
 0x36c   : > { %v1012_v27 = vmax.f32 %v1010_v25, %v1011_v26 }
 0x36e   : > { %v1013_v28 = vrot.slane %v1012_v27, 2 }
 0x370   : > { %v1014_v29 = vmax.f32 %v1012_v27, %v1013_v28 }
 0x372   : > { %v1015_v30 = vrot.slane %v1014_v29, 1 }
 0x374   : > { %v1016_v31 = vmax.f32 %v1014_v29, %v1015_v30 }
 0x376   : > { %v1017_v32 = vsub.f32 %v1007_v23, %v1016_v31 }
 0x378   : > { %v1018_v33 = vmul.f32 1.442695, %v1017_v32 }
 0x37a   : > { %2094 = vpow2.f32 %v1018_v33 }
 0x384   : > { %v2095_v35 = vpop.eup %2094 }
 0x385   : > { %v1020_v36 = vsel %vm831_vm7, %v2095_v35, 0.0 }
 0x386   : > { %v1021_v37 = vrot.slane %v1020_v36, 4 }
 0x388   : > { %v1022_v38 = vadd.f32 %v1021_v37, %v1020_v36 }
 0x38a   : > { %v1023_v39 = vrot.slane %v1022_v38, 2 }
 0x38c   : > { %v1024_v40 = vadd.f32 %v1023_v39, %v1022_v38 }
 0x38e   : > { %v1025_v41 = vrot.slane %v1024_v40, 1 }
 0x390   : > { %v1026_v42 = vadd.f32 %v1025_v41, %v1024_v40 }
 0x392   : > { %2096 = vrcp.f32 %v1026_v42 }
 0x39c   : > { %v2097_v47 = vpop.eup %2096 }
 0x39d   : > { %v1028_v48 = vmul.f32 %v2097_v47, %v2095_v35  ;;  %v1491_v47 = vld [vmem:[#allocation8 + $0x10] sm:$0xff] }
 0x39f   : > { %1868 = vmatmul.mubr.msk.f32.vlgmr.msra.gmra.mrb[4].mxu0 %vm831_vm7, %v1028_v48  ;;  %v1964_v48 = vpack.c.bf16 %v1490_v46, %v1489_v45 }
 0x3a0   : > { %1950 = vmatpush3.bf16.xpose.msk.msra.mxu0 %vm2648_vm3, %v1948_v51  ;;  %1874 = vmatprep.mubr.msk.f32.mxu0 %vm2303_vm0, %v2304_v1  ;;  %v1492_v51 = vld [vmem:[#allocation8 + $0x18] sm:$0xff] }
 0x3a1   : > { %1959 = vmatprep.subr.bf16.mxu0 %v2302_v0  ;;  %v1967_v52 = vpack.c.bf16 %v1492_v51, %v1491_v47 }
 0x3a7   : > { %1875 = vmatmul.mubr.msk.f32.vlgmr.msra.gmra.mrb[6].mxu0 %vm751_vm2, %v1111_v43 }
 0x3a8   : > { %1962 = vmatpush3.bf16.msk.msra.mxu0 %vm2661_vm6, %v1960_v55  ;;  %1895 = vmatprep.mubr.msk.f32.mxu0 %vm2303_vm0, %v2304_v1 }
 0x3a9   : > { %1963 = vmatprep.subr.bf16.mxu0 %v2302_v0 }
 0x472   : > { %v1106_v56 = vpop.f32.mrb[4].mxu0 }
 0x473   : > { %1473 = vrot.lane.b32.xlu0 %v1106_v56, %s2310_s11  ;;  %v1869_v57 = vpop.f32.mrb[5].mxu0  ;;  %s2313_s11 = smov [#allocation10]  }
 0x47a   : > { %v1188_v58 = vpop.f32.mrb[6].mxu0 }
 0x47b   : > { %v1189_v59 = vadd.f32 %v1188_v58, %v2671_v50  ;;  %v1876_v60 = vpop.f32.mrb[7].mxu0 }
 0x47d   : > { %v1192_v61 = vsel %vm831_vm7, %v1189_v59, -inf }
 0x47e   : > { %v1193_v62 = vrot.slane %v1192_v61, 4 }
 0x480   : > { %v1194_v63 = vmax.f32 %v1192_v61, %v1193_v62 }
 0x482   : > { %v1195_v2 = vrot.slane %v1194_v63, 2 }
 0x484   : > { %v1196_v49 = vmax.f32 %v1194_v63, %v1195_v2 }
 0x486   : > { %v1197_v3 = vrot.slane %v1196_v49, 1 }
 0x488   : > { %v1198_v4 = vmax.f32 %v1196_v49, %v1197_v3 }
 0x48a   : > { %v1199_v5 = vsub.f32 %v1189_v59, %v1198_v4 }
 0x48c   : > { %v1200_v6 = vmul.f32 1.442695, %v1199_v5 }
 0x48e   : > { %2098 = vpow2.f32 %v1200_v6 }
 0x498   : > { %v2099_v7 = vpop.eup %2098 }
 0x499   : > { %v1202_v8 = vsel %vm831_vm7, %v2099_v7, 0.0 }
 0x49a   : > { %v1203_v9 = vrot.slane %v1202_v8, 4 }
 0x49c   : > { %v1204_v10 = vadd.f32 %v1203_v9, %v1202_v8 }
 0x49e   : > { %v1205_v11 = vrot.slane %v1204_v10, 2 }
 0x4a0   : > { %v1206_v12 = vadd.f32 %v1205_v11, %v1204_v10 }
 0x4a2   : > { %v1207_v13 = vrot.slane %v1206_v12, 1 }
 0x4a4   : > { %v1208_v14 = vadd.f32 %v1207_v13, %v1206_v12 }
 0x4a6   : > { %2100 = vrcp.f32 %v1208_v14 }
 0x4b0   : > { %v2101_v17 = vpop.eup %2100 }
 0x4b1   : > { %v1210_v18 = vmul.f32 %v2101_v17, %v2099_v7 }
 0x4b3   : > { %1882 = vmatmul.mubr.msk.f32.vlgmr.msra.gmra.mrb[8].mxu1 %vm831_vm7, %v1210_v18 }
 0x4b4   : > { %1958 = vmatpush3.bf16.xpose.msk.msra.mxu1 %vm2648_vm3, %v1956_v19  ;;  %1888 = vmatprep.mubr.msk.f32.mxu1 %vm2303_vm0, %v2304_v1 }
 0x4bb   : > { %1889 = vmatmul.mubr.msk.f32.vlgmr.msra.gmra.mrb[10].mxu1 %vm751_vm2, %v1292_v21 }
 0x4e5   : > { %v1474_v55 = vpop.permute.xlu0 %1473 }
 0x586   : > { %v1287_v22 = vpop.f32.mrb[8].mxu1 }
 0x587   : > { %1477 = vrot.lane.b32.xlu1 %v1287_v22, %s2311_s25  ;;  %v1883_v23 = vpop.f32.mrb[9].mxu1  ;;  %s2224_s25 = sshll.u32 %s2313_s11, 4  ;;  %s2225_s25 = int_to_ptr.vmem [resolvable:$false] %s2224_s25 }
 0x588   : > { %p2227_p7 = scmp.lt.s32.totalorder %s2735_s0, %s2225_s25 }
 0x58e   : > { %v1369_v24 = vpop.f32.mrb[10].mxu1 }
 0x58f   : > { %v1370_v25 = vadd.f32 %v1369_v24, %v2671_v50  ;;  %v1890_v26 = vpop.f32.mrb[11].mxu1 }
 0x591   : > { %v1373_v27 = vsel %vm831_vm7, %v1370_v25, -inf }
 0x592   : > { %v1374_v28 = vrot.slane %v1373_v27, 4 }
 0x594   : > { %v1375_v29 = vmax.f32 %v1373_v27, %v1374_v28 }
 0x596   : > { %v1376_v34 = vrot.slane %v1375_v29, 2 }
 0x598   : > { %v1377_v30 = vmax.f32 %v1375_v29, %v1376_v34 }
 0x59a   : > { %v1378_v31 = vrot.slane %v1377_v30, 1 }
 0x59c   : > { %v1379_v32 = vmax.f32 %v1377_v30, %v1378_v31 }
 0x59e   : > { %v1380_v33 = vsub.f32 %v1370_v25, %v1379_v32 }
 0x5a0   : > { %v1381_v35 = vmul.f32 1.442695, %v1380_v33 }
 0x5a2   : > { %2102 = vpow2.f32 %v1381_v35 }
 0x5ac   : > { %v2103_v36 = vpop.eup %2102 }
 0x5ad   : > { %v1383_v37 = vsel %vm831_vm7, %v2103_v36, 0.0 }
 0x5ae   : > { %v1384_v38 = vrot.slane %v1383_v37, 4 }
 0x5b0   : > { %v1385_v39 = vadd.f32 %v1384_v38, %v1383_v37 }
 0x5b2   : > { %v1386_v40 = vrot.slane %v1385_v39, 2 }
 0x5b4   : > { %v1387_v41 = vadd.f32 %v1386_v40, %v1385_v39 }
 0x5b6   : > { %v1388_v50 = vrot.slane %v1387_v41, 1 }
 0x5b8   : > { %v1389_v42 = vadd.f32 %v1388_v50, %v1387_v41 }
 0x5ba   : > { %2104 = vrcp.f32 %v1389_v42 }
 0x5c4   : > { %v2105_v43 = vpop.eup %2104 }
 0x5c5   : > { %v1391_v44 = vmul.f32 %v2105_v43, %v2103_v36 }
 0x5c7   : > { %1896 = vmatmul.mubr.msk.f32.vlgmr.msra.gmra.mrb[8].mxu0 %vm831_vm7, %v1391_v44 }
 0x5c8   : > { %1906 = vmatprep.mubr.msk.f32.mxu0 %vm2303_vm0, %v2304_v1  ;;  %1965 = vmatpush3.bf16.msra.mxu0 %v1964_v48  ;;  %v1484_v1 = vsel %vm751_vm2, %v2688_v20, %v1474_v55 }
 0x5c9   : > { %1966 = vmatprep.subr.bf16.mxu0 %v2302_v0  ;;  %v1756_v0 = vld [vmem:[%s2788_s10] ss:$0 sm:$0xff] }
 0x5cc   : > { %1968 = vmatpush3.bf16.msra.mxu0 %v1967_v52 }
 0x5f9   : > { %v1478_v56 = vpop.permute.xlu1 %1477 }
 0x5fa   : > { %v1486_v57 = vsel %vm1485_vm8, %v1484_v1, %v1478_v56 }
 0x69a   : > { %v1468_v53 = vpop.f32.mrb[8].mxu0 }
 0x69b   : > { %1481 = vrot.lane.b32.xlu0 %v1468_v53, %s2312_s23  ;;  %v1897_v54 = vpop.f32.mrb[9].mxu0  ;;  %s2226_s23 = scalar_lea.vmem %s2225_s25, 256 }
 0x69c   : > { %p2228_p10 = scmp.lt.s32.totalorder %s2226_s23, %s2220_s21 }
 0x69e   : > { %p2229_p13 = por %p2228_p10, %p2227_p7 }
 0x6a0   : > { %p2230_p5 = pnand %p2229_p13, %p2223_p3 }
 0x70d   : > { %v1482_v58 = vpop.permute.xlu0 %1481 }
 0x70e   : > { %v1488_v59 = vsel %vm1487_vm9, %v1486_v57, %v1482_v58 }
 0x70f   : > { %1907 = vmatmul.mubr.msk.f32.vlgmr.msra.gmra.mrb[10].mxu0 %vm494_vm1, %v1488_v59 }
 0x7e2   : > { %v1569_v60 = vpop.f32.mrb[10].mxu0 }
 0x7e3   : > { %v1570_v61 = vadd.f32 %v1756_v0, %v1569_v60  ;;  %v1908_v62 = vpop.f32.mrb[11].mxu0 }
 0x7e5   : > { %1573 = vst.msk [vmem:[%s469_s29] sm:$0xff] %vm494_vm1, %v1570_v61 }
 0x7e6   : > { %2233 = shalt.err (!%p2230_p5)
}
 0x7e7   : > { %s2234_s16 = scalar_lea.hbm %s2733_s4, 128  ;;  %s2238_s24 = scalar_lea.hbm %s2823_s27, 256 }
 0x7e8   : > { %p2235_p0 = scmp.ne.s32.totalorder %s2733_s4, %s2234_s16  ;;  %p2239_p12 = scmp.lt.u32.totalorder %s2733_s4, %s2823_s27 }
 0x7e9   : > { %p2240_p2 = scmp.lt.u32.totalorder %s2238_s24, %s2234_s16  ;;  %p2242_p4 = scmp.lt.u32.totalorder %s2234_s16, %s2733_s4 }
 0x7ea   : > { %p2236_p11 = pnand %p2235_p0, %p2517_p6 }
 0x7eb   : > { %p2241_p1 = por %p2240_p2, %p2239_p12 }
 0x7ec   : > { %p2237_p9 = pneg %p2236_p11 }
 0x7ed   : > { %p2243_p8 = por %p2242_p4, %p2241_p1 }
 0x7ef   : > { %p2244_p3 = pnand %p2243_p8, %p2237_p9 }
 0x7f1   : > { %2247 = shalt.err (!%p2244_p3)
}
 0x7f2   : > { %1983 = dma.vmem_to_hbm [thread:$0]  (%p2517_p6), %s2735_s0, 128, %s2733_s4, %s1575_s28  }
 0x7f3 PF: > { %s2824_s30 = sld [smem:[#allocation15_spill]]  ;;  %s2825_s22 = sld [smem:[#allocation16_spill]] }
 0x7f4   : > { %p2827_p10 = scmp.ge.s32.totalorder %s2294_s20, 2 }
 0x7f9   : > { %s1600_s21 = sand.u32 1, %s2824_s30   ;;  %p2826_p7 = scmp.ne.s32.totalorder %s2825_s22, 0 }
 0x7fa   : > { %s1601_s11 = scalar_lea.sflag [#allocation4], %s1600_s21 }
 0x7fb   : > { %p2000_p13 = pnand %p2827_p10, %p2826_p7 }
 0x7fd   : > { %2277 = dma.done.wait (!%p2000_p13), %s1601_s11, 128  }
 0x7fe   : > { %2279 = vsyncadd (!%p2000_p13), %s1601_s11, 4294967168  ;;  %p26_p5 = scmp.ge.s32.totalorder %s2503_s26, 4   ;;  %s2828_s17 = smov %s2286_s18 }
 0x7ff   : > { %s2829_s18 = smov %s2290_s19  ;;  %s2830_s19 = smov %s2513_s12 }
 0x800   : > { %s2831_s20 = smov %s2503_s26  ;;  %28 = sbr.rel (!%p26_p5) target bundleno = 11 (0xb), region = 127 }
 0x807   :  { %1606 = vsyncpa [#allocation3], 1 }
 0x808   :  { %1608 = vsyncpa [#allocation3 + $0x1], 1 }
 0x809   :  { %1609 = vsyncpa [#allocation6], 1 }
 0x80a   :  { %1610 = vsyncpa [#allocation9], 1 }
 0x80b   :  { %1611 = vsyncpa [#allocation4], 1 }
 0x80c   :  { %1613 = vsyncpa [#allocation4 + $0x1], 1 }

</bundles_post_ra>
